<compile_context>
chip_gen: v7x
topology: tpu7x:2x2x1
jax: 0.10.0
libtpu: 0.0.40
codegen_flags: <defaults>
</compile_context>

<pallas_src>
import jax
import jax.numpy as jnp
from jax.experimental import pallas as pl
from jax.experimental.pallas import tpu as pltpu


def _mlp_kernel(x_ref, w0_ref, b0_ref, w1_ref, b1_ref, w2_ref, b2_ref, o_ref):
    # fc0 + ReLU: bf16 operands on the MXU, f32 accumulate; store activation in bf16.
    h0 = jnp.dot(x_ref[...].astype(jnp.bfloat16), w0_ref[...],
                 preferred_element_type=jnp.float32)
    h0 = jnp.maximum(h0 + b0_ref[...], 0.0).astype(jnp.bfloat16)
    # fc1 + ReLU
    h1 = jnp.dot(h0, w1_ref[...], preferred_element_type=jnp.float32)
    h1 = jnp.maximum(h1 + b1_ref[...], 0.0).astype(jnp.bfloat16)
    # fc2 + final ReLU (commutes with the (B, A, 2) reshape done in the wrapper)
    h2 = jnp.dot(h1, w2_ref[...], preferred_element_type=jnp.float32)
    o_ref[...] = jnp.maximum(h2 + b2_ref[...], 0.0)


def _choose_tm(B):
    # Single grid step for small/medium batches: amortizes the whole weight fetch
    # over the whole batch and removes per-step grid overhead.
    if B <= 1024:
        return B
    for t in (512, 256, 128, 64, 32, 16, 8):
        if B % t == 0:
            return t
    return None  # pathological batch size -> padded fallback


def reinforce_forward(x, params, *, tm=None):
    """x: (B, state_size) float32 -> (B, action_size, 2) float32."""
    w0, b0, w1, b1, w2, b2 = params
    B, S = x.shape
    out_dim = w2.shape[1]            # action_size * 2
    action_size = out_dim // 2

    if tm is None or (tm != B and B % tm != 0):
        tm = _choose_tm(B)

    if tm is None:
        # Last-resort fallback only (never hit for B <= 1024 or B % 8 == 0).
        tm = 256
        b_pad = pl.cdiv(B, tm) * tm
        x = jnp.pad(x, ((0, b_pad - B), (0, 0)))
    else:
        b_pad = B

    grid = (b_pad // tm,)

    # Advisory cost hint for XLA's scheduler.
    flops = 2 * b_pad * (S * 1024 + 1024 * 512 + 512 * out_dim)
    bytes_accessed = (
        b_pad * S * 4                                   # x (f32 in)
        + 2 * (S * 1024 + 1024 * 512 + 512 * out_dim)   # bf16 weights
        + 4 * (1024 + 512 + out_dim)                    # f32 biases
        + b_pad * out_dim * 4                           # f32 out
    )
    cost = pl.CostEstimate(flops=int(flops), transcendentals=0,
                           bytes_accessed=int(bytes_accessed))

    out_flat = pl.pallas_call(
        _mlp_kernel,
        out_shape=jax.ShapeDtypeStruct((b_pad, out_dim), jnp.float32),
        grid=grid,
        in_specs=[
            pl.BlockSpec((tm, S), lambda i: (i, 0)),      # activation tile (streamed)
            pl.BlockSpec(w0.shape, lambda i: (0, 0)),     # weights/biases: constant
            pl.BlockSpec(b0.shape, lambda i: (0, 0)),     # block index -> VMEM-
            pl.BlockSpec(w1.shape, lambda i: (0, 0)),     # resident, no per-step
            pl.BlockSpec(b1.shape, lambda i: (0, 0)),     # re-DMA.
            pl.BlockSpec(w2.shape, lambda i: (0, 0)),
            pl.BlockSpec(b2.shape, lambda i: (0, 0)),
        ],
        out_specs=pl.BlockSpec((tm, out_dim), lambda i: (i, 0)),
        compiler_params=pltpu.CompilerParams(
            dimension_semantics=("parallel",),            # megacore when grid > 1
        ),
        cost_estimate=cost,
    )(x, w0, b0, w1, b1, w2, b2)

    if b_pad != B:
        out_flat = out_flat[:B]

    # torch: reshape(x, (B, x.shape[1] // 2, 2)) then relu (relu applied in-kernel).
    return out_flat.reshape(B, action_size, 2)


def init_params(key, state_size, action_size):
    """Deterministic init mimicking nn.Linear uniform(-1/sqrt(fan_in), 1/sqrt(fan_in)).
    Weights stored transposed as (in, out) in bfloat16; biases kept f32."""
    dims = [(state_size, 1024), (1024, 512), (512, action_size * 2)]
    params = []
    for (din, dout) in dims:
        key, kw, kb = jax.random.split(key, 3)
        bound = 1.0 / (din ** 0.5)
        w = jax.random.uniform(kw, (din, dout), jnp.float32, -bound, bound)
        b = jax.random.uniform(kb, (1, dout), jnp.float32, -bound, bound)
        params += [w.astype(jnp.bfloat16), b]
    return params


def _reference(x, params, action_size):
    w0, b0, w1, b1, w2, b2 = params
    h = jnp.dot(x.astype(jnp.bfloat16), w0, preferred_element_type=jnp.float32)
    h = jnp.maximum(h + b0, 0.0)
    h = jnp.dot(h.astype(jnp.bfloat16), w1, preferred_element_type=jnp.float32)
    h = jnp.maximum(h + b1, 0.0)
    h = jnp.dot(h.astype(jnp.bfloat16), w2, preferred_element_type=jnp.float32)
    h = h + b2
    return jnp.maximum(h.reshape(x.shape[0], action_size, 2), 0.0)


if __name__ == "__main__":
    key = jax.random.PRNGKey(0)
    state_size = (16,)      # small state
    action_size = 4         # fc2 out = 8

    k_x, k_x2, k_p = jax.random.split(key, 3)
    params = init_params(k_p, state_size[0], action_size)

    # Case 1: small batch -> single grid step (tm = B), no padding.
    B = 8
    x = jax.random.normal(k_x, (B, state_size[0]), jnp.float32)
    out = jax.block_until_ready(reinforce_forward(x, params))
    ref = _reference(x, params, action_size)
    assert out.shape == (B, action_size, 2)
    assert jnp.allclose(out, ref, atol=2e-2, rtol=2e-2), \
        float(jnp.max(jnp.abs(out - ref)))

    # Case 2: exercise the multi-tile (grid > 1) path with a tiny forced tile.
    B2 = 16
    x2 = jax.random.normal(k_x2, (B2, state_size[0]), jnp.float32)
    out2 = jax.block_until_ready(reinforce_forward(x2, params, tm=8))
    ref2 = _reference(x2, params, action_size)
    assert out2.shape == (B2, action_size, 2)
    assert jnp.allclose(out2, ref2, atol=2e-2, rtol=2e-2), \
        float(jnp.max(jnp.abs(out2 - ref2)))

    print("KERNEL_OK")
</pallas_src>

<mosaic_0001>
module attributes {stable_mosaic.version = 11 : i64} {
  func.func @_mlp_kernel(%arg0: i32, %arg1: memref<8x16xf32, #tpu.memory_space<vmem>>, %arg2: memref<16x1024xbf16, #tpu.memory_space<vmem>>, %arg3: memref<1x1024xf32, #tpu.memory_space<vmem>>, %arg4: memref<1024x512xbf16, #tpu.memory_space<vmem>>, %arg5: memref<1x512xf32, #tpu.memory_space<vmem>>, %arg6: memref<512x8xbf16, #tpu.memory_space<vmem>>, %arg7: memref<1x8xf32, #tpu.memory_space<vmem>>, %arg8: memref<8x8xf32, #tpu.memory_space<vmem>>) attributes {dimension_semantics = [#tpu.dimension_semantics<parallel>], iteration_bounds = array<i64: 1>, scalar_prefetch = 0 : i64, scratch_operands = 0 : i64, tpu.core_type = #tpu.core_type<tc>, window_params = [{transform_indices = @transform_0, window_bounds = array<i64: 8, 16>}, {pipeline_mode = #tpu.pipeline_mode<synchronous>, transform_indices = @transform_1, window_bounds = array<i64: 16, 1024>}, {pipeline_mode = #tpu.pipeline_mode<synchronous>, transform_indices = @transform_2, window_bounds = array<i64: 1, 1024>}, {pipeline_mode = #tpu.pipeline_mode<synchronous>, transform_indices = @transform_3, window_bounds = array<i64: 1024, 512>}, {pipeline_mode = #tpu.pipeline_mode<synchronous>, transform_indices = @transform_4, window_bounds = array<i64: 1, 512>}, {pipeline_mode = #tpu.pipeline_mode<synchronous>, transform_indices = @transform_5, window_bounds = array<i64: 512, 8>}, {pipeline_mode = #tpu.pipeline_mode<synchronous>, transform_indices = @transform_6, window_bounds = array<i64: 1, 8>}, {transform_indices = @transform_7, window_bounds = array<i64: 8, 8>}]} {
    %c0 = arith.constant 0 : index
    %c0_0 = arith.constant 0 : index
    %0 = vector.load %arg1[%c0, %c0_0] : memref<8x16xf32, #tpu.memory_space<vmem>>, vector<8x16xf32>
    %1 = arith.truncf %0 : vector<8x16xf32> to vector<8x16xbf16>
    %c0_1 = arith.constant 0 : index
    %c0_2 = arith.constant 0 : index
    %2 = vector.load %arg2[%c0_1, %c0_2] : memref<16x1024xbf16, #tpu.memory_space<vmem>>, vector<16x1024xbf16>
    %cst = arith.constant dense<0.000000e+00> : vector<8x1024xf32>
    %3 = tpu.matmul %1, %2, %cst {dimension_numbers = #tpu.dot_dimension_numbers<[1], [0], [0], [1], [0, 0, 1, 1], [], []>} : vector<8x16xbf16>, vector<16x1024xbf16>, vector<8x1024xf32> -> vector<8x1024xf32>
    %c0_3 = arith.constant 0 : index
    %c0_4 = arith.constant 0 : index
    %4 = vector.load %arg3[%c0_3, %c0_4] : memref<1x1024xf32, #tpu.memory_space<vmem>>, vector<1x1024xf32>
    %5 = vector.broadcast %4 : vector<1x1024xf32> to vector<8x1024xf32>
    %6 = arith.addf %3, %5 : vector<8x1024xf32>
    %cst_5 = arith.constant 0.000000e+00 : f32
    %7 = vector.broadcast %cst_5 : f32 to vector<8x1024xf32>
    %8 = arith.maximumf %6, %7 : vector<8x1024xf32>
    %9 = arith.truncf %8 : vector<8x1024xf32> to vector<8x1024xbf16>
    %c0_6 = arith.constant 0 : index
    %c0_7 = arith.constant 0 : index
    %10 = vector.load %arg4[%c0_6, %c0_7] : memref<1024x512xbf16, #tpu.memory_space<vmem>>, vector<1024x512xbf16>
    %cst_8 = arith.constant dense<0.000000e+00> : vector<8x512xf32>
    %11 = tpu.matmul %9, %10, %cst_8 {dimension_numbers = #tpu.dot_dimension_numbers<[1], [0], [0], [1], [0, 0, 1, 1], [], []>} : vector<8x1024xbf16>, vector<1024x512xbf16>, vector<8x512xf32> -> vector<8x512xf32>
    %c0_9 = arith.constant 0 : index
    %c0_10 = arith.constant 0 : index
    %12 = vector.load %arg5[%c0_9, %c0_10] : memref<1x512xf32, #tpu.memory_space<vmem>>, vector<1x512xf32>
    %13 = vector.broadcast %12 : vector<1x512xf32> to vector<8x512xf32>
    %14 = arith.addf %11, %13 : vector<8x512xf32>
    %cst_11 = arith.constant 0.000000e+00 : f32
    %15 = vector.broadcast %cst_11 : f32 to vector<8x512xf32>
    %16 = arith.maximumf %14, %15 : vector<8x512xf32>
    %17 = arith.truncf %16 : vector<8x512xf32> to vector<8x512xbf16>
    %c0_12 = arith.constant 0 : index
    %c0_13 = arith.constant 0 : index
    %18 = vector.load %arg6[%c0_12, %c0_13] : memref<512x8xbf16, #tpu.memory_space<vmem>>, vector<512x8xbf16>
    %cst_14 = arith.constant dense<0.000000e+00> : vector<8x8xf32>
    %19 = tpu.matmul %17, %18, %cst_14 {dimension_numbers = #tpu.dot_dimension_numbers<[1], [0], [0], [1], [0, 0, 1, 1], [], []>} : vector<8x512xbf16>, vector<512x8xbf16>, vector<8x8xf32> -> vector<8x8xf32>
    %c0_15 = arith.constant 0 : index
    %c0_16 = arith.constant 0 : index
    %20 = vector.load %arg7[%c0_15, %c0_16] : memref<1x8xf32, #tpu.memory_space<vmem>>, vector<1x8xf32>
    %21 = vector.broadcast %20 : vector<1x8xf32> to vector<8x8xf32>
    %22 = arith.addf %19, %21 : vector<8x8xf32>
    %cst_17 = arith.constant 0.000000e+00 : f32
    %23 = vector.broadcast %cst_17 : f32 to vector<8x8xf32>
    %24 = arith.maximumf %22, %23 : vector<8x8xf32>
    %c0_18 = arith.constant 0 : index
    %c0_19 = arith.constant 0 : index
    %25 = vector.load %arg8[%c0_18, %c0_19] : memref<8x8xf32, #tpu.memory_space<vmem>>, vector<8x8xf32>
    tpu.vector_store %arg8[%c0_18, %c0_19], %24 {strides = array<i32>} : memref<8x8xf32, #tpu.memory_space<vmem>>, vector<8x8xf32>,
    return
  }
  func.func @transform_0(%arg0: i32) -> (i32, i32) {
    %c0_i32 = arith.constant 0 : i32
    %c0_i32_0 = arith.constant 0 : i32
    return %arg0, %c0_i32 : i32, i32
  }
  func.func @transform_1(%arg0: i32) -> (i32, i32) {
    %c0_i32 = arith.constant 0 : i32
    %c0_i32_0 = arith.constant 0 : i32
    %c0_i32_1 = arith.constant 0 : i32
    return %c0_i32, %c0_i32_0 : i32, i32
  }
  func.func @transform_2(%arg0: i32) -> (i32, i32) {
    %c0_i32 = arith.constant 0 : i32
    %c0_i32_0 = arith.constant 0 : i32
    %c0_i32_1 = arith.constant 0 : i32
    return %c0_i32, %c0_i32_0 : i32, i32
  }
  func.func @transform_3(%arg0: i32) -> (i32, i32) {
    %c0_i32 = arith.constant 0 : i32
    %c0_i32_0 = arith.constant 0 : i32
    %c0_i32_1 = arith.constant 0 : i32
    return %c0_i32, %c0_i32_0 : i32, i32
  }
  func.func @transform_4(%arg0: i32) -> (i32, i32) {
    %c0_i32 = arith.constant 0 : i32
    %c0_i32_0 = arith.constant 0 : i32
    %c0_i32_1 = arith.constant 0 : i32
    return %c0_i32, %c0_i32_0 : i32, i32
  }
  func.func @transform_5(%arg0: i32) -> (i32, i32) {
    %c0_i32 = arith.constant 0 : i32
    %c0_i32_0 = arith.constant 0 : i32
    %c0_i32_1 = arith.constant 0 : i32
    return %c0_i32, %c0_i32_0 : i32, i32
  }
  func.func @transform_6(%arg0: i32) -> (i32, i32) {
    %c0_i32 = arith.constant 0 : i32
    %c0_i32_0 = arith.constant 0 : i32
    %c0_i32_1 = arith.constant 0 : i32
    return %c0_i32, %c0_i32_0 : i32, i32
  }
  func.func @transform_7(%arg0: i32) -> (i32, i32) {
    %c0_i32 = arith.constant 0 : i32
    %c0_i32_0 = arith.constant 0 : i32
    return %arg0, %c0_i32 : i32, i32
  }
}

</mosaic_0001>

<bundles_post_ra>
// kernel: tpu_custom_call.1
= control target key start
LH: loop header
LB: loop body
LE: loop exit
PB: predicated region body
PF: predicated region fallthrough
CT: control target
= control target key end

     0   :  { %12 = vsyncpa [#allocation3], 0  ;;  %s3671_s0 = inlined_call_operand.vmem [shape: f32[8,16], index: 0, kind: input, shape index: {}]   ;;  %s3672_s1 = inlined_call_operand.vmem [shape: bf16[16,1024], index: 1, kind: input, shape index: {}]   ;;  %s3673_s2 = inlined_call_operand.vmem [shape: f32[1,1024], index: 2, kind: input, shape index: {}]   ;;  %s3674_s3 = inlined_call_operand.hbm [shape: bf16[1024,512], index: 3, kind: input, shape index: {}]   ;;  %s3675_s4 = inlined_call_operand.vmem [shape: f32[1,512], index: 4, kind: input, shape index: {}]   ;;  %s3676_s5 = inlined_call_operand.vmem [shape: bf16[512,8], index: 5, kind: input, shape index: {}]   ;;  %s3677_s6 = inlined_call_operand.vmem [shape: f32[1,8], index: 6, kind: input, shape index: {}]   ;;  %s3678_s7 = inlined_call_operand.hbm [shape: f32[8,8], index: 7, kind: output, shape index: {}]  }
   0x1   :  { %13 = vsyncpa [#allocation4], 0  ;;  %s3415_s24 = smov [#allocation2]   ;;  %s3367_s28 = scalar_lea.hbm %s3674_s3, 32768 }
   0x2   :  { %s25_s25 = sshll.u32 %s3415_s24, 4  ;;  %p3368_p0 = scmp.ne.s32.totalorder %s3674_s3, %s3367_s28  ;;  %s26_s25 = int_to_ptr.vmem [resolvable:$true] %s25_s25 }
   0x3   :  { %p3371_p1 = scmp.lt.u32.totalorder %s3367_s28, %s3674_s3 }
   0x5   :  { %p3373_p2 = pnand %p3371_p1, %p3368_p0 }
   0x7   :  { %3376 = shalt.err (!%p3373_p2)
}
   0x8   :  { %s3377_s10 = scalar_lea.vmem %s26_s25, 32768  ;;  %p3382_p4 = scmp.lt.s32.totalorder %s26_s25, %s26_s25 }
   0x9   :  { %p3378_p3 = scmp.ne.s32.totalorder %s26_s25, %s3377_s10  ;;  %p3383_p5 = scmp.lt.s32.totalorder %s3377_s10, %s3377_s10 }
   0xb   :  { %p3384_p6 = por %p3383_p5, %p3382_p4 }
   0xd   :  { %p3385_p7 = pnand %p3384_p6, %p3378_p3 }
   0xf   :  { %3388 = shalt.err (!%p3385_p7)
}
  0x10   :  { %s3416_s11 = smov 256   ;;  %s3417_s12 = smov 16  }
  0x11   :  { %31 = dma.hbm_to_vmem [thread:$0]  %s3674_s3, 32768, %s26_s25, [#allocation3], %s3416_s11, %s3416_s11, %s3417_s12  }
  0x12   :  { %3411 = dma.done.wait [#allocation3], 32768  }
  0x13   :  { %3412 = vsyncadd [#allocation3], 4294934528  ;;  %v3418_v0 = vmov 0   ;;  %v44_v1 = vld [vmem:[%s3672_s1] sm:$0xff]  ;;  %v45_v6 = vld [vmem:[%s3672_s1 + $0x8] sm:$0xff]  ;;  %vm134_vm0 = vcmask 130048  }
  0x14   :  { %170 = vmatprep.mubr.bf16.mxu0 %v3418_v0  ;;  %211 = vmatprep.mubr.bf16.mxu1 %v3418_v0  ;;  %v48_v2 = vld [vmem:[%s3672_s1 + $0x20] sm:$0xff]  ;;  %v49_v7 = vld [vmem:[%s3672_s1 + $0x28] sm:$0xff]  ;;  %v46_v8 = vld [vmem:[%s3672_s1 + $0x10] sm:$0xff]  ;;  %s3419_s20 = smov [#allocation5]   ;;  %vm2556_vm1 = vcmask 64512  }
  0x15   :  { %v42_v3 = vld [vmem:[%s3671_s0] sm:$0xff]  ;;  %v2574_v4 = vcombine.high %v44_v1, %v48_v2  ;;  %v2573_v5 = vcombine.low %v44_v1, %v48_v2  ;;  %v2576_v9 = vcombine.high %v45_v6, %v49_v7  ;;  %v2575_v10 = vcombine.low %v45_v6, %v49_v7  ;;  %v50_v11 = vld [vmem:[%s3672_s1 + $0x30] sm:$0xff]  ;;  %v47_v12 = vld [vmem:[%s3672_s1 + $0x18] sm:$0xff]  ;;  %s2564_s3 = sshll.u32 %s3419_s20, 4  ;;  %s2565_s3 = int_to_ptr.vmem [resolvable:$true] %s2564_s3 }
  0x16   :  { %v51_v13 = vld [vmem:[%s3672_s1 + $0x38] sm:$0xff]  ;;  %v43_v14 = vpack.c.bf16 %v42_v3, %v42_v3  ;;  %v2578_v15 = vcombine.high %v46_v8, %v50_v11  ;;  %v2577_v17 = vcombine.low %v46_v8, %v50_v11  ;;  %v2953_v19 = vld [vmem:[#allocation2 + $0x4] ss:$16 sps:$4 sm:$0xff]   ;;  %v2951_v21 = vld [vmem:[#allocation2] ss:$16 sps:$4 sm:$0xff]   ;;  %s3389_s21 = scalar_lea.vmem %s2565_s3, 128  ;;  %p3394_p9 = scmp.lt.s32.totalorder %s2565_s3, %s2565_s3 }
  0x17   :  { %138 = vmatprep.subr.bf16.mxu0 %v2574_v4  ;;  %v2580_v16 = vcombine.high %v47_v12, %v51_v13  ;;  %179 = vmatprep.subr.bf16.mxu1 %v2576_v9  ;;  %v2579_v18 = vcombine.low %v47_v12, %v51_v13  ;;  %v2956_v20 = vld [vmem:[#allocation2 + $0xc] ss:$16 sps:$4 sm:$0xff]   ;;  %v2954_v22 = vld [vmem:[#allocation2 + $0x8] ss:$16 sps:$4 sm:$0xff]   ;;  %v2959_v23 = vld [vmem:[#allocation2 + $0x24] ss:$16 sps:$4 sm:$0xff]   ;;  %p3390_p8 = scmp.ne.s32.totalorder %s2565_s3, %s3389_s21  ;;  %p3395_p10 = scmp.lt.s32.totalorder %s3389_s21, %s3389_s21 }
  0x18   :  { %139 = vmatpush1.bf16.msra.mxu0 %v2573_v5  ;;  %180 = vmatpush1.bf16.msra.mxu1 %v2575_v10  ;;  %v2962_v24 = vld [vmem:[#allocation2 + $0x2c] ss:$16 sps:$4 sm:$0xff]   ;;  %v2957_v25 = vld [vmem:[#allocation2 + $0x20] ss:$16 sps:$4 sm:$0xff]   ;;  %v2960_v26 = vld [vmem:[#allocation2 + $0x28] ss:$16 sps:$4 sm:$0xff]  }
  0x19   :  { %220 = vmatprep.subr.bf16.mxu0 %v2578_v15  ;;  %261 = vmatprep.subr.bf16.mxu1 %v2580_v16  ;;  %v2965_v27 = vld [vmem:[#allocation2 + $0x44] ss:$16 sps:$4 sm:$0xff]   ;;  %v2968_v28 = vld [vmem:[#allocation2 + $0x4c] ss:$16 sps:$4 sm:$0xff]   ;;  %v2963_v29 = vld [vmem:[#allocation2 + $0x40] ss:$16 sps:$4 sm:$0xff]   ;;  %p3396_p11 = por %p3395_p10, %p3394_p9 }
  0x1a   :  { %v2966_v30 = vld [vmem:[#allocation2 + $0x48] ss:$16 sps:$4 sm:$0xff]   ;;  %v2971_v31 = vld [vmem:[#allocation2 + $0x64] ss:$16 sps:$4 sm:$0xff]   ;;  %v2974_v32 = vld [vmem:[#allocation2 + $0x6c] ss:$16 sps:$4 sm:$0xff]  }
  0x1b   :  { %2581 = vmatmul.mubr.msk.bf16.vlgmr.msra.gmra.mrb[0].mxu0 %vm134_vm0, %v43_v14  ;;  %2582 = vmatmul.mubr.msk.bf16.vlgmr.msra.gmra.mrb[0].mxu1 %vm134_vm0, %v43_v14  ;;  %v2969_v33 = vld [vmem:[#allocation2 + $0x60] ss:$16 sps:$4 sm:$0xff]   ;;  %v2972_v34 = vld [vmem:[#allocation2 + $0x68] ss:$16 sps:$4 sm:$0xff]   ;;  %v2977_v35 = vld [vmem:[#allocation2 + $0x84] ss:$16 sps:$4 sm:$0xff]   ;;  %p3397_p12 = pnand %p3396_p11, %p3390_p8 }
  0x1c   :  { %221 = vmatpush1.bf16.msra.mxu0 %v2577_v17  ;;  %252 = vmatprep.mubr.bf16.mxu0 %v3418_v0  ;;  %v2980_v36 = vld [vmem:[#allocation2 + $0x8c] ss:$16 sps:$4 sm:$0xff]   ;;  %v2975_v37 = vld [vmem:[#allocation2 + $0x80] ss:$16 sps:$4 sm:$0xff]   ;;  %v2978_v38 = vld [vmem:[#allocation2 + $0x88] ss:$16 sps:$4 sm:$0xff]  }
  0x1d   :  { %262 = vmatpush1.bf16.msra.mxu1 %v2579_v18  ;;  %293 = vmatprep.mubr.bf16.mxu1 %v3418_v0  ;;  %v2983_v39 = vld [vmem:[#allocation2 + $0xa4] ss:$16 sps:$4 sm:$0xff]   ;;  %v2986_v40 = vld [vmem:[#allocation2 + $0xac] ss:$16 sps:$4 sm:$0xff]   ;;  %v2981_v41 = vld [vmem:[#allocation2 + $0xa0] ss:$16 sps:$4 sm:$0xff]  }
  0x1e   :  { %1876 = vmatprep.subr.bf16.mxu0 %v2953_v19  ;;  %2040 = vmatprep.subr.bf16.mxu1 %v2956_v20  ;;  %v2984_v42 = vld [vmem:[#allocation2 + $0xa8] ss:$16 sps:$4 sm:$0xff]   ;;  %v2989_v43 = vld [vmem:[#allocation2 + $0xc4] ss:$16 sps:$4 sm:$0xff]   ;;  %v2992_v44 = vld [vmem:[#allocation2 + $0xcc] ss:$16 sps:$4 sm:$0xff]  }
  0x1f   :  { %v2987_v45 = vld [vmem:[#allocation2 + $0xc0] ss:$16 sps:$4 sm:$0xff]   ;;  %v2990_v46 = vld [vmem:[#allocation2 + $0xc8] ss:$16 sps:$4 sm:$0xff]   ;;  %v2995_v47 = vld [vmem:[#allocation2 + $0xe4] ss:$16 sps:$4 sm:$0xff]  }
  0x20   :  { %v2993_v48 = vld [vmem:[#allocation2 + $0xe0] ss:$16 sps:$4 sm:$0xff]   ;;  %v2998_v49 = vld [vmem:[#allocation2 + $0xec] ss:$16 sps:$4 sm:$0xff]   ;;  %v2996_v50 = vld [vmem:[#allocation2 + $0xe8] ss:$16 sps:$4 sm:$0xff]  }
  0x21   :  { %v3001_v51 = vld [vmem:[#allocation2 + $0x104] ss:$16 sps:$4 sm:$0xff]   ;;  %v3004_v52 = vld [vmem:[#allocation2 + $0x10c] ss:$16 sps:$4 sm:$0xff]   ;;  %v2999_v53 = vld [vmem:[#allocation2 + $0x100] ss:$16 sps:$4 sm:$0xff]  }
  0x22   :  { %v3002_v54 = vld [vmem:[#allocation2 + $0x108] ss:$16 sps:$4 sm:$0xff]   ;;  %v3007_v55 = vld [vmem:[#allocation2 + $0x124] ss:$16 sps:$4 sm:$0xff]   ;;  %v3010_v56 = vld [vmem:[#allocation2 + $0x12c] ss:$16 sps:$4 sm:$0xff]  }
  0x23   :  { %2583 = vmatmul.mubr.msk.bf16.vlgmr.msra.gmra.mrb[4].mxu0 %vm134_vm0, %v43_v14  ;;  %2584 = vmatmul.mubr.msk.bf16.vlgmr.msra.gmra.mrb[4].mxu1 %vm134_vm0, %v43_v14  ;;  %v3005_v57 = vld [vmem:[#allocation2 + $0x120] ss:$16 sps:$4 sm:$0xff]   ;;  %v3008_v58 = vld [vmem:[#allocation2 + $0x128] ss:$16 sps:$4 sm:$0xff]   ;;  %v3013_v59 = vld [vmem:[#allocation2 + $0x144] ss:$16 sps:$4 sm:$0xff]  }
  0x24   :  { %1877 = vmatpush1.bf16.msra.mxu0 %v2951_v21  ;;  %2041 = vmatpush1.bf16.msra.mxu1 %v2954_v22  ;;  %v3016_v60 = vld [vmem:[#allocation2 + $0x14c] ss:$16 sps:$4 sm:$0xff]   ;;  %v3011_v61 = vld [vmem:[#allocation2 + $0x140] ss:$16 sps:$4 sm:$0xff]   ;;  %v3014_v62 = vld [vmem:[#allocation2 + $0x148] ss:$16 sps:$4 sm:$0xff]   ;;  %v54_v21 = vlaneseq }
  0x25   :  { %1878 = vmatprep.subr.bf16.mxu0 %v2959_v23  ;;  %2042 = vmatprep.subr.bf16.mxu1 %v2962_v24  ;;  %v3019_v63 = vld [vmem:[#allocation2 + $0x164] ss:$16 sps:$4 sm:$0xff]   ;;  %v3022_v0 = vld [vmem:[#allocation2 + $0x16c] ss:$16 sps:$4 sm:$0xff]   ;;  %v3017_v1 = vld [vmem:[#allocation2 + $0x160] ss:$16 sps:$4 sm:$0xff]  }
  0x26   :  { %v3020_v2 = vld [vmem:[#allocation2 + $0x168] ss:$16 sps:$4 sm:$0xff]   ;;  %v3025_v3 = vld [vmem:[#allocation2 + $0x184] ss:$16 sps:$4 sm:$0xff]   ;;  %v3028_v4 = vld [vmem:[#allocation2 + $0x18c] ss:$16 sps:$4 sm:$0xff]  }
  0x27   :  { %v3023_v5 = vld [vmem:[#allocation2 + $0x180] ss:$16 sps:$4 sm:$0xff]   ;;  %v3026_v6 = vld [vmem:[#allocation2 + $0x188] ss:$16 sps:$4 sm:$0xff]   ;;  %v3031_v7 = vld [vmem:[#allocation2 + $0x1a4] ss:$16 sps:$4 sm:$0xff]  }
  0x28   :  { %1879 = vmatpush1.bf16.msra.mxu0 %v2957_v25  ;;  %2043 = vmatpush1.bf16.msra.mxu1 %v2960_v26  ;;  %v3034_v8 = vld [vmem:[#allocation2 + $0x1ac] ss:$16 sps:$4 sm:$0xff]   ;;  %v3029_v9 = vld [vmem:[#allocation2 + $0x1a0] ss:$16 sps:$4 sm:$0xff]   ;;  %v3032_v10 = vld [vmem:[#allocation2 + $0x1a8] ss:$16 sps:$4 sm:$0xff]  }
  0x29   :  { %1880 = vmatprep.subr.bf16.mxu0 %v2965_v27  ;;  %2044 = vmatprep.subr.bf16.mxu1 %v2968_v28  ;;  %v3037_v11 = vld [vmem:[#allocation2 + $0x1c4] ss:$16 sps:$4 sm:$0xff]   ;;  %v3040_v12 = vld [vmem:[#allocation2 + $0x1cc] ss:$16 sps:$4 sm:$0xff]   ;;  %v3035_v13 = vld [vmem:[#allocation2 + $0x1c0] ss:$16 sps:$4 sm:$0xff]  }
  0x2a   :  { %v3038_v14 = vld [vmem:[#allocation2 + $0x1c8] ss:$16 sps:$4 sm:$0xff]   ;;  %v3043_v15 = vld [vmem:[#allocation2 + $0x1e4] ss:$16 sps:$4 sm:$0xff]   ;;  %v3046_v16 = vld [vmem:[#allocation2 + $0x1ec] ss:$16 sps:$4 sm:$0xff]  }
  0x2b   :  { %v3041_v17 = vld [vmem:[#allocation2 + $0x1e0] ss:$16 sps:$4 sm:$0xff]   ;;  %v3044_v18 = vld [vmem:[#allocation2 + $0x1e8] ss:$16 sps:$4 sm:$0xff]   ;;  %v3049_v19 = vld [vmem:[#allocation2 + $0x204] ss:$16 sps:$4 sm:$0xff]  }
  0x2c   :  { %1881 = vmatpush1.bf16.msra.mxu0 %v2963_v29  ;;  %2045 = vmatpush1.bf16.msra.mxu1 %v2966_v30  ;;  %v3052_v20 = vld [vmem:[#allocation2 + $0x20c] ss:$16 sps:$4 sm:$0xff]   ;;  %v3503_v22 = vshrl.u32 %v54_v21, 7  ;;  %v3509_v24 = vld [vmem:[%s3673_s2] sm:$0xff] }
  0x2d   :  { %1882 = vmatprep.subr.bf16.mxu0 %v2971_v31  ;;  %2046 = vmatprep.subr.bf16.mxu1 %v2974_v32  ;;  %v3097_v21 = vld [vmem:[#allocation2 + $0x304] ss:$16 sps:$4 sm:$0xff]  }
  0x2e   :  { %v56_v23 = vsub.s32 0, %v3503_v22  ;;  %v60_v25 = vsub.s32 1, %v3503_v22  ;;  %v68_v26 = vsub.s32 3, %v3503_v22 }
  0x30   :  { %1883 = vmatpush1.bf16.msra.mxu0 %v2969_v33  ;;  %2047 = vmatpush1.bf16.msra.mxu1 %v2972_v34  ;;  %v57_v27 = vrot.slane %v3509_v24, %v56_v23  ;;  %v61_v28 = vrot.slane %v3509_v24, %v60_v25  ;;  %v69_v29 = vrot.slane %v3509_v24, %v68_v26 }
  0x31   :  { %1884 = vmatprep.subr.bf16.mxu0 %v2977_v35  ;;  %2048 = vmatprep.subr.bf16.mxu1 %v2980_v36 }
  0x34   :  { %1885 = vmatpush1.bf16.msra.mxu0 %v2975_v37  ;;  %2049 = vmatpush1.bf16.msra.mxu1 %v2978_v38 }
  0x35   :  { %1886 = vmatprep.subr.bf16.mxu0 %v2983_v39  ;;  %2050 = vmatprep.subr.bf16.mxu1 %v2986_v40 }
  0x38   :  { %1887 = vmatpush1.bf16.msra.mxu0 %v2981_v41  ;;  %2051 = vmatpush1.bf16.msra.mxu1 %v2984_v42 }
  0x39   :  { %1888 = vmatprep.subr.bf16.mxu0 %v2989_v43  ;;  %2052 = vmatprep.subr.bf16.mxu1 %v2992_v44 }
  0x3c   :  { %1889 = vmatpush1.bf16.msra.mxu0 %v2987_v45  ;;  %2053 = vmatpush1.bf16.msra.mxu1 %v2990_v46  ;;  %v3047_v45 = vld [vmem:[#allocation2 + $0x200] ss:$16 sps:$4 sm:$0xff]   ;;  %v3050_v46 = vld [vmem:[#allocation2 + $0x208] ss:$16 sps:$4 sm:$0xff]  }
  0x3d   :  { %1890 = vmatprep.subr.bf16.mxu0 %v2995_v47  ;;  %2054 = vmatprep.subr.bf16.mxu1 %v2998_v49  ;;  %v3058_v49 = vld [vmem:[#allocation2 + $0x22c] ss:$16 sps:$4 sm:$0xff]  }
  0x40   :  { %1891 = vmatpush1.bf16.msra.mxu0 %v2993_v48  ;;  %2055 = vmatpush1.bf16.msra.mxu1 %v2996_v50  ;;  %v3055_v48 = vld [vmem:[#allocation2 + $0x224] ss:$16 sps:$4 sm:$0xff]  }
  0x41   :  { %1892 = vmatprep.subr.bf16.mxu0 %v3001_v51  ;;  %2056 = vmatprep.subr.bf16.mxu1 %v3004_v52 }
  0x44   :  { %1893 = vmatpush1.bf16.msra.mxu0 %v2999_v53  ;;  %2057 = vmatpush1.bf16.msra.mxu1 %v3002_v54  ;;  %v3053_v53 = vld [vmem:[#allocation2 + $0x220] ss:$16 sps:$4 sm:$0xff]   ;;  %v3056_v54 = vld [vmem:[#allocation2 + $0x228] ss:$16 sps:$4 sm:$0xff]  }
  0x45   :  { %1894 = vmatprep.subr.bf16.mxu0 %v3007_v55  ;;  %2058 = vmatprep.subr.bf16.mxu1 %v3010_v56  ;;  %v3061_v56 = vld [vmem:[#allocation2 + $0x244] ss:$16 sps:$4 sm:$0xff]  }
  0x48   :  { %1895 = vmatpush1.bf16.msra.mxu0 %v3005_v57  ;;  %2059 = vmatpush1.bf16.msra.mxu1 %v3008_v58  ;;  %v3064_v57 = vld [vmem:[#allocation2 + $0x24c] ss:$16 sps:$4 sm:$0xff]  }
  0x49   :  { %1896 = vmatprep.subr.bf16.mxu0 %v3013_v59  ;;  %2060 = vmatprep.subr.bf16.mxu1 %v3016_v60  ;;  %v3059_v59 = vld [vmem:[#allocation2 + $0x240] ss:$16 sps:$4 sm:$0xff]   ;;  %v3062_v60 = vld [vmem:[#allocation2 + $0x248] ss:$16 sps:$4 sm:$0xff]  }
  0x4c   :  { %1897 = vmatpush1.bf16.msra.mxu0 %v3011_v61  ;;  %2061 = vmatpush1.bf16.msra.mxu1 %v3014_v62  ;;  %v3067_v61 = vld [vmem:[#allocation2 + $0x264] ss:$16 sps:$4 sm:$0xff]   ;;  %v3070_v62 = vld [vmem:[#allocation2 + $0x26c] ss:$16 sps:$4 sm:$0xff]  }
  0x4d   :  { %1898 = vmatprep.subr.bf16.mxu0 %v3019_v63  ;;  %2062 = vmatprep.subr.bf16.mxu1 %v3022_v0  ;;  %v3065_v63 = vld [vmem:[#allocation2 + $0x260] ss:$16 sps:$4 sm:$0xff]   ;;  %v3068_v0 = vld [vmem:[#allocation2 + $0x268] ss:$16 sps:$4 sm:$0xff]  }
  0x50   :  { %1899 = vmatpush1.bf16.msra.mxu0 %v3017_v1  ;;  %2063 = vmatpush1.bf16.msra.mxu1 %v3020_v2  ;;  %v3073_v1 = vld [vmem:[#allocation2 + $0x284] ss:$16 sps:$4 sm:$0xff]   ;;  %v3076_v2 = vld [vmem:[#allocation2 + $0x28c] ss:$16 sps:$4 sm:$0xff]  }
  0x51   :  { %1900 = vmatprep.subr.bf16.mxu0 %v3025_v3  ;;  %2064 = vmatprep.subr.bf16.mxu1 %v3028_v4  ;;  %v3071_v3 = vld [vmem:[#allocation2 + $0x280] ss:$16 sps:$4 sm:$0xff]   ;;  %v3074_v4 = vld [vmem:[#allocation2 + $0x288] ss:$16 sps:$4 sm:$0xff]  }
  0x54   :  { %1901 = vmatpush1.bf16.msra.mxu0 %v3023_v5  ;;  %2065 = vmatpush1.bf16.msra.mxu1 %v3026_v6  ;;  %v3079_v5 = vld [vmem:[#allocation2 + $0x2a4] ss:$16 sps:$4 sm:$0xff]   ;;  %v3082_v6 = vld [vmem:[#allocation2 + $0x2ac] ss:$16 sps:$4 sm:$0xff]  }
  0x55   :  { %1902 = vmatprep.subr.bf16.mxu0 %v3031_v7  ;;  %2066 = vmatprep.subr.bf16.mxu1 %v3034_v8  ;;  %v3077_v7 = vld [vmem:[#allocation2 + $0x2a0] ss:$16 sps:$4 sm:$0xff]   ;;  %v3080_v8 = vld [vmem:[#allocation2 + $0x2a8] ss:$16 sps:$4 sm:$0xff]  }
  0x58   :  { %1903 = vmatpush1.bf16.msra.mxu0 %v3029_v9  ;;  %2067 = vmatpush1.bf16.msra.mxu1 %v3032_v10  ;;  %v3085_v10 = vld [vmem:[#allocation2 + $0x2c4] ss:$16 sps:$4 sm:$0xff]  }
  0x59   :  { %1904 = vmatprep.subr.bf16.mxu0 %v3037_v11  ;;  %2068 = vmatprep.subr.bf16.mxu1 %v3040_v12  ;;  %v3088_v11 = vld [vmem:[#allocation2 + $0x2cc] ss:$16 sps:$4 sm:$0xff]  }
  0x5c   :  { %1905 = vmatpush1.bf16.msra.mxu0 %v3035_v13  ;;  %2069 = vmatpush1.bf16.msra.mxu1 %v3038_v14 }
  0x5d   :  { %1906 = vmatprep.subr.bf16.mxu0 %v3043_v15  ;;  %2070 = vmatprep.subr.bf16.mxu1 %v3046_v16  ;;  %v3083_v15 = vld [vmem:[#allocation2 + $0x2c0] ss:$16 sps:$4 sm:$0xff]   ;;  %v3086_v16 = vld [vmem:[#allocation2 + $0x2c8] ss:$16 sps:$4 sm:$0xff]  }
  0x60   :  { %1907 = vmatpush1.bf16.msra.mxu0 %v3041_v17  ;;  %2071 = vmatpush1.bf16.msra.mxu1 %v3044_v18  ;;  %v3091_v17 = vld [vmem:[#allocation2 + $0x2e4] ss:$16 sps:$4 sm:$0xff]   ;;  %v3094_v18 = vld [vmem:[#allocation2 + $0x2ec] ss:$16 sps:$4 sm:$0xff]  }
  0x61   :  { %1917 = vmatprep.subr.bf16.mxu0 %v3049_v19  ;;  %2081 = vmatprep.subr.bf16.mxu1 %v3052_v20  ;;  %v3089_v19 = vld [vmem:[#allocation2 + $0x2e0] ss:$16 sps:$4 sm:$0xff]   ;;  %v3092_v20 = vld [vmem:[#allocation2 + $0x2e8] ss:$16 sps:$4 sm:$0xff]  }
  0xee   :  { %v172_v30 = vpop.f32.mrb[0].mxu0  ;;  %v3522_v33 = vpop.f32.mrb[0].mxu1 }
  0xef   :  { %v173_v31 = vadd.f32 %v172_v30, %v57_v27  ;;  %v174_v32 = vpop.f32.mrb[1].mxu0  ;;  %v215_v36 = vpop.f32.mrb[1].mxu1  ;;  %v3100_v27 = vld [vmem:[#allocation2 + $0x30c] ss:$16 sps:$4 sm:$0xff]   ;;  %v3103_v30 = vld [vmem:[#allocation2 + $0x324] ss:$16 sps:$4 sm:$0xff]  }
  0xf0   :  { %v175_v34 = vadd.f32 %v174_v32, %v61_v28  ;;  %v176_v35 = vpop.f32.mrb[2].mxu0  ;;  %v216_v39 = vadd.f32 %v215_v36, %v69_v29  ;;  %v217_v40 = vpop.f32.mrb[2].mxu1  ;;  %v3095_v28 = vld [vmem:[#allocation2 + $0x300] ss:$16 sps:$4 sm:$0xff]   ;;  %v3098_v29 = vld [vmem:[#allocation2 + $0x308] ss:$16 sps:$4 sm:$0xff]  }
  0xf1   :  { %v302_v37 = vmax.f32 %v173_v31, 0.0  ;;  %v177_v38 = vpop.f32.mrb[3].mxu0  ;;  %v218_v42 = vpop.f32.mrb[3].mxu1  ;;  %v3106_v31 = vld [vmem:[#allocation2 + $0x32c] ss:$16 sps:$4 sm:$0xff]  }
  0xf2   :  { %v303_v41 = vmax.f32 %v175_v34, 0.0  ;;  %v305_v43 = vmax.f32 %v216_v39, 0.0  ;;  %v3101_v32 = vld [vmem:[#allocation2 + $0x320] ss:$16 sps:$4 sm:$0xff]   ;;  %v3104_v34 = vld [vmem:[#allocation2 + $0x328] ss:$16 sps:$4 sm:$0xff]  }
  0xf3   :  { %v310_v47 = vpack.c.bf16 %v302_v37, %v302_v37  ;;  %v3109_v35 = vld [vmem:[#allocation2 + $0x344] ss:$16 sps:$4 sm:$0xff]   ;;  %v3112_v36 = vld [vmem:[#allocation2 + $0x34c] ss:$16 sps:$4 sm:$0xff]   ;;  %v3107_v37 = vld [vmem:[#allocation2 + $0x340] ss:$16 sps:$4 sm:$0xff]  }
  0xf4   :  { %v311_v44 = vpack.c.bf16 %v303_v41, %v303_v41  ;;  %v313_v50 = vpack.c.bf16 %v305_v43, %v305_v43  ;;  %v3110_v38 = vld [vmem:[#allocation2 + $0x348] ss:$16 sps:$4 sm:$0xff]   ;;  %v3115_v39 = vld [vmem:[#allocation2 + $0x364] ss:$16 sps:$4 sm:$0xff]   ;;  %v3118_v40 = vld [vmem:[#allocation2 + $0x36c] ss:$16 sps:$4 sm:$0xff]  }
  0xf5   :  { %v3113_v41 = vld [vmem:[#allocation2 + $0x360] ss:$16 sps:$4 sm:$0xff]   ;;  %v3116_v42 = vld [vmem:[#allocation2 + $0x368] ss:$16 sps:$4 sm:$0xff]   ;;  %v3121_v43 = vld [vmem:[#allocation2 + $0x384] ss:$16 sps:$4 sm:$0xff]  }
  0xf6   :  { %1908 = vmatprep.mubr.bf16.mxu0 %v311_v44  ;;  %2072 = vmatprep.mubr.bf16.mxu1 %v311_v44  ;;  %v3524_v51 = vpop.f32.mrb[4].mxu0  ;;  %v3528_v9 = vpop.f32.mrb[4].mxu1  ;;  %v3124_v44 = vld [vmem:[#allocation2 + $0x38c] ss:$16 sps:$4 sm:$0xff]  }
  0xf7   :  { %1909 = vmatmul.mubr.bf16.vlgmr.msra.gmra.mrb[8].mxu0 %v310_v47  ;;  %2073 = vmatmul.mubr.bf16.vlgmr.msra.gmra.mrb[8].mxu1 %v310_v47  ;;  %v3526_v52 = vpop.f32.mrb[5].mxu0  ;;  %v3530_v12 = vpop.f32.mrb[5].mxu1  ;;  %v3122_v47 = vld [vmem:[#allocation2 + $0x388] ss:$16 sps:$4 sm:$0xff]  }
  0xf8   :  { %1918 = vmatpush1.bf16.msra.mxu0 %v3047_v45  ;;  %2082 = vmatpush1.bf16.msra.mxu1 %v3050_v46  ;;  %v258_v55 = vpop.f32.mrb[6].mxu0  ;;  %v299_v13 = vpop.f32.mrb[6].mxu1  ;;  %v64_v45 = vsub.s32 2, %v3503_v22  ;;  %v3119_v46 = vld [vmem:[#allocation2 + $0x380] ss:$16 sps:$4 sm:$0xff]  }
  0xf9   :  { %1919 = vmatprep.subr.bf16.mxu0 %v3055_v48  ;;  %2083 = vmatprep.subr.bf16.mxu1 %v3058_v49  ;;  %v259_v58 = vpop.f32.mrb[7].mxu0  ;;  %v300_v14 = vpop.f32.mrb[7].mxu1  ;;  %v3127_v48 = vld [vmem:[#allocation2 + $0x3a4] ss:$16 sps:$4 sm:$0xff]   ;;  %v3130_v49 = vld [vmem:[#allocation2 + $0x3ac] ss:$16 sps:$4 sm:$0xff]  }
  0xfa   :  { %1949 = vmatprep.mubr.bf16.mxu0 %v313_v50  ;;  %2113 = vmatprep.mubr.bf16.mxu1 %v313_v50  ;;  %v76_v50 = vsub.s32 5, %v3503_v22  ;;  %v3128_v55 = vld [vmem:[#allocation2 + $0x3a8] ss:$16 sps:$4 sm:$0xff]   ;;  %v3149_v13 = vld [vmem:[#allocation2 + $0x420] ss:$16 sps:$4 sm:$0xff]  }
  0xfb   :  { %v3152_v14 = vld [vmem:[#allocation2 + $0x428] ss:$16 sps:$4 sm:$0xff]  }
  0xfc   :  { %1920 = vmatpush1.bf16.msra.mxu0 %v3053_v53  ;;  %2084 = vmatpush1.bf16.msra.mxu1 %v3056_v54  ;;  %v65_v53 = vrot.slane %v3509_v24, %v64_v45  ;;  %v3125_v54 = vld [vmem:[#allocation2 + $0x3a0] ss:$16 sps:$4 sm:$0xff]   ;;  %v77_v58 = vrot.slane %v3509_v24, %v76_v50  ;;  %v3199_v50 = vld [vmem:[#allocation2 + $0x524] ss:$16 sps:$4 sm:$0xff]  }
  0xfd   :  { %1921 = vmatprep.subr.bf16.mxu0 %v3061_v56  ;;  %2085 = vmatprep.subr.bf16.mxu1 %v3064_v57  ;;  %v3133_v56 = vld [vmem:[#allocation2 + $0x3c4] ss:$16 sps:$4 sm:$0xff]   ;;  %v3136_v57 = vld [vmem:[#allocation2 + $0x3cc] ss:$16 sps:$4 sm:$0xff]  }
 0x100   :  { %1922 = vmatpush1.bf16.msra.mxu0 %v3059_v59  ;;  %2086 = vmatpush1.bf16.msra.mxu1 %v3062_v60  ;;  %v214_v59 = vadd.f32 %v3522_v33, %v65_v53  ;;  %v3131_v60 = vld [vmem:[#allocation2 + $0x3c0] ss:$16 sps:$4 sm:$0xff]   ;;  %v3202_v53 = vld [vmem:[#allocation2 + $0x52c] ss:$16 sps:$4 sm:$0xff]  }
 0x101   :  { %1923 = vmatprep.subr.bf16.mxu0 %v3067_v61  ;;  %2087 = vmatprep.subr.bf16.mxu1 %v3070_v62  ;;  %v3134_v61 = vld [vmem:[#allocation2 + $0x3c8] ss:$16 sps:$4 sm:$0xff]   ;;  %v3139_v62 = vld [vmem:[#allocation2 + $0x3e4] ss:$16 sps:$4 sm:$0xff]  }
 0x104   :  { %1924 = vmatpush1.bf16.msra.mxu0 %v3065_v63  ;;  %2088 = vmatpush1.bf16.msra.mxu1 %v3068_v0  ;;  %v3142_v63 = vld [vmem:[#allocation2 + $0x3ec] ss:$16 sps:$4 sm:$0xff]   ;;  %v257_v0 = vadd.f32 %v3526_v52, %v77_v58  ;;  %v3203_v58 = vld [vmem:[#allocation2 + $0x540] ss:$16 sps:$4 sm:$0xff]  }
 0x105   :  { %1925 = vmatprep.subr.bf16.mxu0 %v3073_v1  ;;  %2089 = vmatprep.subr.bf16.mxu1 %v3076_v2  ;;  %v304_v1 = vmax.f32 %v214_v59, 0.0  ;;  %v3137_v2 = vld [vmem:[#allocation2 + $0x3e0] ss:$16 sps:$4 sm:$0xff]   ;;  %v3206_v59 = vld [vmem:[#allocation2 + $0x548] ss:$16 sps:$4 sm:$0xff]  }
 0x106   :  { %v307_v33 = vmax.f32 %v257_v0, 0.0  ;;  %v3217_v0 = vld [vmem:[#allocation2 + $0x584] ss:$16 sps:$4 sm:$0xff]  }
 0x108   :  { %1926 = vmatpush1.bf16.msra.mxu0 %v3071_v3  ;;  %2090 = vmatpush1.bf16.msra.mxu1 %v3074_v4  ;;  %v3140_v3 = vld [vmem:[#allocation2 + $0x3e8] ss:$16 sps:$4 sm:$0xff]   ;;  %v3145_v4 = vld [vmem:[#allocation2 + $0x404] ss:$16 sps:$4 sm:$0xff]   ;;  %v315_v52 = vpack.c.bf16 %v307_v33, %v307_v33  ;;  %v3226_v33 = vld [vmem:[#allocation2 + $0x5ac] ss:$16 sps:$4 sm:$0xff]  }
 0x109   :  { %1927 = vmatprep.subr.bf16.mxu0 %v3079_v5  ;;  %2091 = vmatprep.subr.bf16.mxu1 %v3082_v6  ;;  %v3148_v5 = vld [vmem:[#allocation2 + $0x40c] ss:$16 sps:$4 sm:$0xff]   ;;  %v312_v6 = vpack.c.bf16 %v304_v1, %v304_v1 }
 0x10a   :  { %v3220_v1 = vld [vmem:[#allocation2 + $0x58c] ss:$16 sps:$4 sm:$0xff]  }
 0x10c   :  { %1928 = vmatpush1.bf16.msra.mxu0 %v3077_v7  ;;  %2092 = vmatpush1.bf16.msra.mxu1 %v3080_v8  ;;  %v3143_v7 = vld [vmem:[#allocation2 + $0x400] ss:$16 sps:$4 sm:$0xff]   ;;  %v3146_v8 = vld [vmem:[#allocation2 + $0x408] ss:$16 sps:$4 sm:$0xff]  }
 0x10d   :  { %1929 = vmatprep.subr.bf16.mxu0 %v3085_v10  ;;  %2093 = vmatprep.subr.bf16.mxu1 %v3088_v11  ;;  %v3151_v10 = vld [vmem:[#allocation2 + $0x424] ss:$16 sps:$4 sm:$0xff]   ;;  %v3154_v11 = vld [vmem:[#allocation2 + $0x42c] ss:$16 sps:$4 sm:$0xff]  }
 0x110   :  { %1930 = vmatpush1.bf16.msra.mxu0 %v3083_v15  ;;  %2094 = vmatpush1.bf16.msra.mxu1 %v3086_v16  ;;  %v3157_v15 = vld [vmem:[#allocation2 + $0x444] ss:$16 sps:$4 sm:$0xff]   ;;  %v3160_v16 = vld [vmem:[#allocation2 + $0x44c] ss:$16 sps:$4 sm:$0xff]  }
 0x111   :  { %1931 = vmatprep.subr.bf16.mxu0 %v3091_v17  ;;  %2095 = vmatprep.subr.bf16.mxu1 %v3094_v18  ;;  %v3155_v17 = vld [vmem:[#allocation2 + $0x440] ss:$16 sps:$4 sm:$0xff]   ;;  %v3158_v18 = vld [vmem:[#allocation2 + $0x448] ss:$16 sps:$4 sm:$0xff]  }
 0x114   :  { %1932 = vmatpush1.bf16.msra.mxu0 %v3089_v19  ;;  %2096 = vmatpush1.bf16.msra.mxu1 %v3092_v20  ;;  %v3163_v19 = vld [vmem:[#allocation2 + $0x464] ss:$16 sps:$4 sm:$0xff]   ;;  %v3166_v20 = vld [vmem:[#allocation2 + $0x46c] ss:$16 sps:$4 sm:$0xff]  }
 0x115   :  { %1933 = vmatprep.subr.bf16.mxu0 %v3097_v21  ;;  %2097 = vmatprep.subr.bf16.mxu1 %v3100_v27  ;;  %v3161_v21 = vld [vmem:[#allocation2 + $0x460] ss:$16 sps:$4 sm:$0xff]   ;;  %v3164_v27 = vld [vmem:[#allocation2 + $0x468] ss:$16 sps:$4 sm:$0xff]  }
 0x118   :  { %1934 = vmatpush1.bf16.msra.mxu0 %v3095_v28  ;;  %2098 = vmatpush1.bf16.msra.mxu1 %v3098_v29  ;;  %v3169_v28 = vld [vmem:[#allocation2 + $0x484] ss:$16 sps:$4 sm:$0xff]   ;;  %v3172_v29 = vld [vmem:[#allocation2 + $0x48c] ss:$16 sps:$4 sm:$0xff]  }
 0x119   :  { %1935 = vmatprep.subr.bf16.mxu0 %v3103_v30  ;;  %2099 = vmatprep.subr.bf16.mxu1 %v3106_v31  ;;  %v3167_v30 = vld [vmem:[#allocation2 + $0x480] ss:$16 sps:$4 sm:$0xff]   ;;  %v3170_v31 = vld [vmem:[#allocation2 + $0x488] ss:$16 sps:$4 sm:$0xff]  }
 0x11c   :  { %1936 = vmatpush1.bf16.msra.mxu0 %v3101_v32  ;;  %2100 = vmatpush1.bf16.msra.mxu1 %v3104_v34  ;;  %v3175_v32 = vld [vmem:[#allocation2 + $0x4a4] ss:$16 sps:$4 sm:$0xff]   ;;  %v3178_v34 = vld [vmem:[#allocation2 + $0x4ac] ss:$16 sps:$4 sm:$0xff]  }
 0x11d   :  { %1937 = vmatprep.subr.bf16.mxu0 %v3109_v35  ;;  %2101 = vmatprep.subr.bf16.mxu1 %v3112_v36  ;;  %v3173_v35 = vld [vmem:[#allocation2 + $0x4a0] ss:$16 sps:$4 sm:$0xff]   ;;  %v3176_v36 = vld [vmem:[#allocation2 + $0x4a8] ss:$16 sps:$4 sm:$0xff]  }
 0x120   :  { %1938 = vmatpush1.bf16.msra.mxu0 %v3107_v37  ;;  %2102 = vmatpush1.bf16.msra.mxu1 %v3110_v38  ;;  %v3181_v37 = vld [vmem:[#allocation2 + $0x4c4] ss:$16 sps:$4 sm:$0xff]   ;;  %v3184_v38 = vld [vmem:[#allocation2 + $0x4cc] ss:$16 sps:$4 sm:$0xff]  }
 0x121   :  { %1939 = vmatprep.subr.bf16.mxu0 %v3115_v39  ;;  %2103 = vmatprep.subr.bf16.mxu1 %v3118_v40  ;;  %v3179_v39 = vld [vmem:[#allocation2 + $0x4c0] ss:$16 sps:$4 sm:$0xff]   ;;  %v3182_v40 = vld [vmem:[#allocation2 + $0x4c8] ss:$16 sps:$4 sm:$0xff]  }
 0x124   :  { %1940 = vmatpush1.bf16.msra.mxu0 %v3113_v41  ;;  %2104 = vmatpush1.bf16.msra.mxu1 %v3116_v42  ;;  %v3187_v41 = vld [vmem:[#allocation2 + $0x4e4] ss:$16 sps:$4 sm:$0xff]   ;;  %v3190_v42 = vld [vmem:[#allocation2 + $0x4ec] ss:$16 sps:$4 sm:$0xff]  }
 0x125   :  { %1941 = vmatprep.subr.bf16.mxu0 %v3121_v43  ;;  %2105 = vmatprep.subr.bf16.mxu1 %v3124_v44  ;;  %v3185_v43 = vld [vmem:[#allocation2 + $0x4e0] ss:$16 sps:$4 sm:$0xff]   ;;  %v3188_v44 = vld [vmem:[#allocation2 + $0x4e8] ss:$16 sps:$4 sm:$0xff]  }
 0x128   :  { %1942 = vmatpush1.bf16.msra.mxu0 %v3119_v46  ;;  %2106 = vmatpush1.bf16.msra.mxu1 %v3122_v47  ;;  %v3193_v46 = vld [vmem:[#allocation2 + $0x504] ss:$16 sps:$4 sm:$0xff]   ;;  %v3196_v47 = vld [vmem:[#allocation2 + $0x50c] ss:$16 sps:$4 sm:$0xff]  }
 0x129   :  { %1943 = vmatprep.subr.bf16.mxu0 %v3127_v48  ;;  %2107 = vmatprep.subr.bf16.mxu1 %v3130_v49  ;;  %v3191_v48 = vld [vmem:[#allocation2 + $0x500] ss:$16 sps:$4 sm:$0xff]   ;;  %v3194_v49 = vld [vmem:[#allocation2 + $0x508] ss:$16 sps:$4 sm:$0xff]  }
 0x12c   :  { %1944 = vmatpush1.bf16.msra.mxu0 %v3125_v54  ;;  %2108 = vmatpush1.bf16.msra.mxu1 %v3128_v55  ;;  %v3197_v54 = vld [vmem:[#allocation2 + $0x520] ss:$16 sps:$4 sm:$0xff]   ;;  %v3200_v55 = vld [vmem:[#allocation2 + $0x528] ss:$16 sps:$4 sm:$0xff]  }
 0x12d   :  { %1945 = vmatprep.subr.bf16.mxu0 %v3133_v56  ;;  %2109 = vmatprep.subr.bf16.mxu1 %v3136_v57  ;;  %v3205_v56 = vld [vmem:[#allocation2 + $0x544] ss:$16 sps:$4 sm:$0xff]   ;;  %v3208_v57 = vld [vmem:[#allocation2 + $0x54c] ss:$16 sps:$4 sm:$0xff]  }
 0x130   :  { %1946 = vmatpush1.bf16.msra.mxu0 %v3131_v60  ;;  %2110 = vmatpush1.bf16.msra.mxu1 %v3134_v61  ;;  %v3211_v60 = vld [vmem:[#allocation2 + $0x564] ss:$16 sps:$4 sm:$0xff]   ;;  %v3214_v61 = vld [vmem:[#allocation2 + $0x56c] ss:$16 sps:$4 sm:$0xff]  }
 0x131   :  { %1947 = vmatprep.subr.bf16.mxu0 %v3139_v62  ;;  %2111 = vmatprep.subr.bf16.mxu1 %v3142_v63  ;;  %v3209_v62 = vld [vmem:[#allocation2 + $0x560] ss:$16 sps:$4 sm:$0xff]   ;;  %v3212_v63 = vld [vmem:[#allocation2 + $0x568] ss:$16 sps:$4 sm:$0xff]  }
 0x134   :  { %1948 = vmatpush1.bf16.msra.mxu0 %v3137_v2  ;;  %2112 = vmatpush1.bf16.msra.mxu1 %v3140_v3  ;;  %v72_v2 = vsub.s32 4, %v3503_v22  ;;  %v3215_v3 = vld [vmem:[#allocation2 + $0x580] ss:$16 sps:$4 sm:$0xff]  }
 0x135   :  { %1958 = vmatprep.subr.bf16.mxu0 %v3145_v4  ;;  %2122 = vmatprep.subr.bf16.mxu1 %v3148_v5  ;;  %v3218_v4 = vld [vmem:[#allocation2 + $0x588] ss:$16 sps:$4 sm:$0xff]   ;;  %v3223_v5 = vld [vmem:[#allocation2 + $0x5a4] ss:$16 sps:$4 sm:$0xff]  }
 0x137   :  { %1950 = vmatmul.mubr.bf16.vlgmr.msra.gmra.mrb[8].mxu0 %v312_v6  ;;  %2114 = vmatmul.mubr.bf16.vlgmr.msra.gmra.mrb[8].mxu1 %v312_v6  ;;  %v84_v6 = vsub.s32 7, %v3503_v22 }
 0x138   :  { %1959 = vmatpush1.bf16.msra.mxu0 %v3143_v7  ;;  %2123 = vmatpush1.bf16.msra.mxu1 %v3146_v8  ;;  %v73_v7 = vrot.slane %v3509_v24, %v72_v2  ;;  %v3221_v8 = vld [vmem:[#allocation2 + $0x5a0] ss:$16 sps:$4 sm:$0xff]   ;;  %v3292_v2 = vld [vmem:[#allocation2 + $0x70c] ss:$16 sps:$4 sm:$0xff]  }
 0x139   :  { %1960 = vmatprep.subr.bf16.mxu0 %v3151_v10  ;;  %2124 = vmatprep.subr.bf16.mxu1 %v3154_v11  ;;  %v3224_v10 = vld [vmem:[#allocation2 + $0x5a8] ss:$16 sps:$4 sm:$0xff]   ;;  %v3229_v11 = vld [vmem:[#allocation2 + $0x5c4] ss:$16 sps:$4 sm:$0xff]  }
 0x13a   :  { %1990 = vmatprep.mubr.bf16.mxu0 %v315_v52  ;;  %2154 = vmatprep.mubr.bf16.mxu1 %v315_v52  ;;  %v3232_v52 = vld [vmem:[#allocation2 + $0x5cc] ss:$16 sps:$4 sm:$0xff]  }
 0x13c   :  { %1961 = vmatpush1.bf16.msra.mxu0 %v3149_v13  ;;  %2125 = vmatpush1.bf16.msra.mxu1 %v3152_v14  ;;  %v85_v13 = vrot.slane %v3509_v24, %v84_v6  ;;  %v255_v14 = vadd.f32 %v3524_v51, %v73_v7  ;;  %v3293_v6 = vld [vmem:[#allocation2 + $0x720] ss:$16 sps:$4 sm:$0xff]   ;;  %v3296_v7 = vld [vmem:[#allocation2 + $0x728] ss:$16 sps:$4 sm:$0xff]  }
 0x13d   :  { %1962 = vmatprep.subr.bf16.mxu0 %v3157_v15  ;;  %2126 = vmatprep.subr.bf16.mxu1 %v3160_v16  ;;  %v3227_v15 = vld [vmem:[#allocation2 + $0x5c0] ss:$16 sps:$4 sm:$0xff]   ;;  %v3230_v16 = vld [vmem:[#allocation2 + $0x5c8] ss:$16 sps:$4 sm:$0xff]  }
 0x140   :  { %1963 = vmatpush1.bf16.msra.mxu0 %v3155_v17  ;;  %2127 = vmatpush1.bf16.msra.mxu1 %v3158_v18  ;;  %v3235_v17 = vld [vmem:[#allocation2 + $0x5e4] ss:$16 sps:$4 sm:$0xff]   ;;  %v3238_v18 = vld [vmem:[#allocation2 + $0x5ec] ss:$16 sps:$4 sm:$0xff]  }
 0x141   :  { %1964 = vmatprep.subr.bf16.mxu0 %v3163_v19  ;;  %2128 = vmatprep.subr.bf16.mxu1 %v3166_v20  ;;  %v298_v19 = vadd.f32 %v3530_v12, %v85_v13  ;;  %v306_v20 = vmax.f32 %v255_v14, 0.0  ;;  %v3307_v13 = vld [vmem:[#allocation2 + $0x764] ss:$16 sps:$4 sm:$0xff]   ;;  %v3310_v14 = vld [vmem:[#allocation2 + $0x76c] ss:$16 sps:$4 sm:$0xff]  }
 0x143   :  { %v309_v51 = vmax.f32 %v298_v19, 0.0  ;;  %v3311_v19 = vld [vmem:[#allocation2 + $0x780] ss:$16 sps:$4 sm:$0xff]  }
 0x144   :  { %1965 = vmatpush1.bf16.msra.mxu0 %v3161_v21  ;;  %2129 = vmatpush1.bf16.msra.mxu1 %v3164_v27  ;;  %v3233_v21 = vld [vmem:[#allocation2 + $0x5e0] ss:$16 sps:$4 sm:$0xff]   ;;  %v3236_v27 = vld [vmem:[#allocation2 + $0x5e8] ss:$16 sps:$4 sm:$0xff]  }
 0x145   :  { %1966 = vmatprep.subr.bf16.mxu0 %v3169_v28  ;;  %2130 = vmatprep.subr.bf16.mxu1 %v3172_v29  ;;  %v3241_v28 = vld [vmem:[#allocation2 + $0x604] ss:$16 sps:$4 sm:$0xff]   ;;  %v3244_v29 = vld [vmem:[#allocation2 + $0x60c] ss:$16 sps:$4 sm:$0xff]   ;;  %v317_v12 = vpack.c.bf16 %v309_v51, %v309_v51  ;;  %v3320_v51 = vld [vmem:[#allocation2 + $0x7a8] ss:$16 sps:$4 sm:$0xff]  }
 0x148   :  { %1967 = vmatpush1.bf16.msra.mxu0 %v3167_v30  ;;  %2131 = vmatpush1.bf16.msra.mxu1 %v3170_v31  ;;  %v314_v30 = vpack.c.bf16 %v306_v20, %v306_v20  ;;  %v3239_v31 = vld [vmem:[#allocation2 + $0x600] ss:$16 sps:$4 sm:$0xff]   ;;  %v3314_v20 = vld [vmem:[#allocation2 + $0x788] ss:$16 sps:$4 sm:$0xff]  }
 0x149   :  { %1968 = vmatprep.subr.bf16.mxu0 %v3175_v32  ;;  %2132 = vmatprep.subr.bf16.mxu1 %v3178_v34  ;;  %v3242_v32 = vld [vmem:[#allocation2 + $0x608] ss:$16 sps:$4 sm:$0xff]   ;;  %v3247_v34 = vld [vmem:[#allocation2 + $0x624] ss:$16 sps:$4 sm:$0xff]  }
 0x14c   :  { %1969 = vmatpush1.bf16.msra.mxu0 %v3173_v35  ;;  %2133 = vmatpush1.bf16.msra.mxu1 %v3176_v36  ;;  %v3250_v35 = vld [vmem:[#allocation2 + $0x62c] ss:$16 sps:$4 sm:$0xff]   ;;  %v3245_v36 = vld [vmem:[#allocation2 + $0x620] ss:$16 sps:$4 sm:$0xff]  }
 0x14d   :  { %1970 = vmatprep.subr.bf16.mxu0 %v3181_v37  ;;  %2134 = vmatprep.subr.bf16.mxu1 %v3184_v38  ;;  %v3248_v37 = vld [vmem:[#allocation2 + $0x628] ss:$16 sps:$4 sm:$0xff]   ;;  %v3253_v38 = vld [vmem:[#allocation2 + $0x644] ss:$16 sps:$4 sm:$0xff]  }
 0x150   :  { %1971 = vmatpush1.bf16.msra.mxu0 %v3179_v39  ;;  %2135 = vmatpush1.bf16.msra.mxu1 %v3182_v40  ;;  %v3256_v39 = vld [vmem:[#allocation2 + $0x64c] ss:$16 sps:$4 sm:$0xff]   ;;  %v3251_v40 = vld [vmem:[#allocation2 + $0x640] ss:$16 sps:$4 sm:$0xff]  }
 0x151   :  { %1972 = vmatprep.subr.bf16.mxu0 %v3187_v41  ;;  %2136 = vmatprep.subr.bf16.mxu1 %v3190_v42  ;;  %v3254_v41 = vld [vmem:[#allocation2 + $0x648] ss:$16 sps:$4 sm:$0xff]   ;;  %v3259_v42 = vld [vmem:[#allocation2 + $0x664] ss:$16 sps:$4 sm:$0xff]  }
 0x154   :  { %1973 = vmatpush1.bf16.msra.mxu0 %v3185_v43  ;;  %2137 = vmatpush1.bf16.msra.mxu1 %v3188_v44  ;;  %v3262_v43 = vld [vmem:[#allocation2 + $0x66c] ss:$16 sps:$4 sm:$0xff]   ;;  %v3257_v44 = vld [vmem:[#allocation2 + $0x660] ss:$16 sps:$4 sm:$0xff]  }
 0x155   :  { %1974 = vmatprep.subr.bf16.mxu0 %v3193_v46  ;;  %2138 = vmatprep.subr.bf16.mxu1 %v3196_v47  ;;  %v3260_v46 = vld [vmem:[#allocation2 + $0x668] ss:$16 sps:$4 sm:$0xff]   ;;  %v3265_v47 = vld [vmem:[#allocation2 + $0x684] ss:$16 sps:$4 sm:$0xff]  }
 0x158   :  { %1975 = vmatpush1.bf16.msra.mxu0 %v3191_v48  ;;  %2139 = vmatpush1.bf16.msra.mxu1 %v3194_v49  ;;  %v3268_v48 = vld [vmem:[#allocation2 + $0x68c] ss:$16 sps:$4 sm:$0xff]   ;;  %v3263_v49 = vld [vmem:[#allocation2 + $0x680] ss:$16 sps:$4 sm:$0xff]  }
 0x159   :  { %1976 = vmatprep.subr.bf16.mxu0 %v3199_v50  ;;  %2140 = vmatprep.subr.bf16.mxu1 %v3202_v53  ;;  %v3266_v50 = vld [vmem:[#allocation2 + $0x688] ss:$16 sps:$4 sm:$0xff]   ;;  %v3271_v53 = vld [vmem:[#allocation2 + $0x6a4] ss:$16 sps:$4 sm:$0xff]  }
 0x15c   :  { %1977 = vmatpush1.bf16.msra.mxu0 %v3197_v54  ;;  %2141 = vmatpush1.bf16.msra.mxu1 %v3200_v55  ;;  %v3274_v54 = vld [vmem:[#allocation2 + $0x6ac] ss:$16 sps:$4 sm:$0xff]   ;;  %v3269_v55 = vld [vmem:[#allocation2 + $0x6a0] ss:$16 sps:$4 sm:$0xff]  }
 0x15d   :  { %1978 = vmatprep.subr.bf16.mxu0 %v3205_v56  ;;  %2142 = vmatprep.subr.bf16.mxu1 %v3208_v57  ;;  %v3272_v56 = vld [vmem:[#allocation2 + $0x6a8] ss:$16 sps:$4 sm:$0xff]   ;;  %v3277_v57 = vld [vmem:[#allocation2 + $0x6c4] ss:$16 sps:$4 sm:$0xff]  }
 0x160   :  { %1979 = vmatpush1.bf16.msra.mxu0 %v3203_v58  ;;  %2143 = vmatpush1.bf16.msra.mxu1 %v3206_v59  ;;  %v3280_v58 = vld [vmem:[#allocation2 + $0x6cc] ss:$16 sps:$4 sm:$0xff]   ;;  %v3275_v59 = vld [vmem:[#allocation2 + $0x6c0] ss:$16 sps:$4 sm:$0xff]  }
 0x161   :  { %1980 = vmatprep.subr.bf16.mxu0 %v3211_v60  ;;  %2144 = vmatprep.subr.bf16.mxu1 %v3214_v61  ;;  %v3278_v60 = vld [vmem:[#allocation2 + $0x6c8] ss:$16 sps:$4 sm:$0xff]   ;;  %v3283_v61 = vld [vmem:[#allocation2 + $0x6e4] ss:$16 sps:$4 sm:$0xff]  }
 0x164   :  { %1981 = vmatpush1.bf16.msra.mxu0 %v3209_v62  ;;  %2145 = vmatpush1.bf16.msra.mxu1 %v3212_v63  ;;  %v3286_v62 = vld [vmem:[#allocation2 + $0x6ec] ss:$16 sps:$4 sm:$0xff]   ;;  %v3281_v63 = vld [vmem:[#allocation2 + $0x6e0] ss:$16 sps:$4 sm:$0xff]  }
 0x165   :  { %1982 = vmatprep.subr.bf16.mxu0 %v3217_v0  ;;  %2146 = vmatprep.subr.bf16.mxu1 %v3220_v1  ;;  %v3284_v0 = vld [vmem:[#allocation2 + $0x6e8] ss:$16 sps:$4 sm:$0xff]   ;;  %v3289_v1 = vld [vmem:[#allocation2 + $0x704] ss:$16 sps:$4 sm:$0xff]  }
 0x168   :  { %1983 = vmatpush1.bf16.msra.mxu0 %v3215_v3  ;;  %2147 = vmatpush1.bf16.msra.mxu1 %v3218_v4  ;;  %v3287_v3 = vld [vmem:[#allocation2 + $0x700] ss:$16 sps:$4 sm:$0xff]   ;;  %v3290_v4 = vld [vmem:[#allocation2 + $0x708] ss:$16 sps:$4 sm:$0xff]  }
 0x169   :  { %1984 = vmatprep.subr.bf16.mxu0 %v3223_v5  ;;  %2148 = vmatprep.subr.bf16.mxu1 %v3226_v33  ;;  %v3295_v5 = vld [vmem:[#allocation2 + $0x724] ss:$16 sps:$4 sm:$0xff]   ;;  %v3298_v33 = vld [vmem:[#allocation2 + $0x72c] ss:$16 sps:$4 sm:$0xff]  }
 0x16c   :  { %1985 = vmatpush1.bf16.msra.mxu0 %v3221_v8  ;;  %2149 = vmatpush1.bf16.msra.mxu1 %v3224_v10  ;;  %v3301_v8 = vld [vmem:[#allocation2 + $0x744] ss:$16 sps:$4 sm:$0xff]   ;;  %v3304_v10 = vld [vmem:[#allocation2 + $0x74c] ss:$16 sps:$4 sm:$0xff]  }
 0x16d   :  { %1986 = vmatprep.subr.bf16.mxu0 %v3229_v11  ;;  %2150 = vmatprep.subr.bf16.mxu1 %v3232_v52  ;;  %v3299_v11 = vld [vmem:[#allocation2 + $0x740] ss:$16 sps:$4 sm:$0xff]   ;;  %v3302_v52 = vld [vmem:[#allocation2 + $0x748] ss:$16 sps:$4 sm:$0xff]  }
 0x170   :  { %1987 = vmatpush1.bf16.msra.mxu0 %v3227_v15  ;;  %2151 = vmatpush1.bf16.msra.mxu1 %v3230_v16  ;;  %v3305_v15 = vld [vmem:[#allocation2 + $0x760] ss:$16 sps:$4 sm:$0xff]   ;;  %v3308_v16 = vld [vmem:[#allocation2 + $0x768] ss:$16 sps:$4 sm:$0xff]  }
 0x171   :  { %1988 = vmatprep.subr.bf16.mxu0 %v3235_v17  ;;  %2152 = vmatprep.subr.bf16.mxu1 %v3238_v18  ;;  %v3313_v17 = vld [vmem:[#allocation2 + $0x784] ss:$16 sps:$4 sm:$0xff]   ;;  %v3316_v18 = vld [vmem:[#allocation2 + $0x78c] ss:$16 sps:$4 sm:$0xff]  }
 0x174   :  { %1989 = vmatpush1.bf16.msra.mxu0 %v3233_v21  ;;  %2153 = vmatpush1.bf16.msra.mxu1 %v3236_v27  ;;  %v80_v21 = vsub.s32 6, %v3503_v22  ;;  %v3319_v27 = vld [vmem:[#allocation2 + $0x7a4] ss:$16 sps:$4 sm:$0xff]  }
 0x175   :  { %1999 = vmatprep.subr.bf16.mxu0 %v3241_v28  ;;  %2163 = vmatprep.subr.bf16.mxu1 %v3244_v29  ;;  %v3322_v28 = vld [vmem:[#allocation2 + $0x7ac] ss:$16 sps:$4 sm:$0xff]   ;;  %v3317_v29 = vld [vmem:[#allocation2 + $0x7a0] ss:$16 sps:$4 sm:$0xff]  }
 0x177   :  { %1991 = vmatmul.mubr.bf16.vlgmr.msra.gmra.mrb[8].mxu0 %v314_v30  ;;  %2155 = vmatmul.mubr.bf16.vlgmr.msra.gmra.mrb[8].mxu1 %v314_v30  ;;  %v81_v30 = vrot.slane %v3509_v24, %v80_v21  ;;  %v3335_v24 = vld [vmem:[%s3676_s5 + $0x40] sm:$0xff]  }
 0x178   :  { %2000 = vmatpush1.bf16.msra.mxu0 %v3239_v31  ;;  %2164 = vmatpush1.bf16.msra.mxu1 %v3242_v32  ;;  %v3325_v31 = vld [vmem:[#allocation2 + $0x7c4] ss:$16 sps:$4 sm:$0xff]   ;;  %v3328_v32 = vld [vmem:[#allocation2 + $0x7cc] ss:$16 sps:$4 sm:$0xff]  }
 0x179   :  { %2001 = vmatprep.subr.bf16.mxu0 %v3247_v34  ;;  %2165 = vmatprep.subr.bf16.mxu1 %v3250_v35  ;;  %v3323_v34 = vld [vmem:[#allocation2 + $0x7c0] ss:$16 sps:$4 sm:$0xff]   ;;  %v3326_v35 = vld [vmem:[#allocation2 + $0x7c8] ss:$16 sps:$4 sm:$0xff]  }
 0x17a   :  { %2031 = vmatprep.mubr.bf16.mxu0 %v317_v12  ;;  %2195 = vmatprep.mubr.bf16.mxu1 %v317_v12  ;;  %v296_v12 = vadd.f32 %v3528_v9, %v81_v30  ;;  %v3337_v9 = vld [vmem:[%s3676_s5] sm:$0xff]  }
 0x17c   :  { %2002 = vmatpush1.bf16.msra.mxu0 %v3245_v36  ;;  %2166 = vmatpush1.bf16.msra.mxu1 %v3248_v37  ;;  %v3331_v36 = vld [vmem:[#allocation2 + $0x7e4] ss:$16 sps:$4 sm:$0xff]   ;;  %v3334_v37 = vld [vmem:[#allocation2 + $0x7ec] ss:$16 sps:$4 sm:$0xff]  }
 0x17d   :  { %2003 = vmatprep.subr.bf16.mxu0 %v3253_v38  ;;  %2167 = vmatprep.subr.bf16.mxu1 %v3256_v39  ;;  %v3329_v38 = vld [vmem:[#allocation2 + $0x7e0] ss:$16 sps:$4 sm:$0xff]   ;;  %v3332_v39 = vld [vmem:[#allocation2 + $0x7e8] ss:$16 sps:$4 sm:$0xff]  }
 0x180   :  { %2004 = vmatpush1.bf16.msra.mxu0 %v3251_v40  ;;  %2168 = vmatpush1.bf16.msra.mxu1 %v3254_v41  ;;  %v308_v40 = vmax.f32 %v296_v12, 0.0  ;;  %v3336_v41 = vld [vmem:[%s3676_s5 + $0xc0] sm:$0xff]  }
 0x181   :  { %2005 = vmatprep.subr.bf16.mxu0 %v3259_v42  ;;  %2169 = vmatprep.subr.bf16.mxu1 %v3262_v43  ;;  %v3338_v42 = vld [vmem:[%s3676_s5 + $0x80] sm:$0xff]  }
 0x182   :  { %v316_v43 = vpack.c.bf16 %v308_v40, %v308_v40 }
 0x184   :  { %2006 = vmatpush1.bf16.msra.mxu0 %v3257_v44  ;;  %2170 = vmatpush1.bf16.msra.mxu1 %v3260_v46  ;;  %v3339_v44 = vld [vmem:[%s3676_s5 + $0x48] sm:$0xff]  }
 0x185   :  { %2007 = vmatprep.subr.bf16.mxu0 %v3265_v47  ;;  %2171 = vmatprep.subr.bf16.mxu1 %v3268_v48  ;;  %v3340_v46 = vld [vmem:[%s3676_s5 + $0xc8] sm:$0xff]  }
 0x186   :  { %v3341_v47 = vld [vmem:[%s3676_s5 + $0x8] sm:$0xff]  }
 0x187   :  { %v3342_v48 = vld [vmem:[%s3676_s5 + $0x88] sm:$0xff]  }
 0x188   :  { %2008 = vmatpush1.bf16.msra.mxu0 %v3263_v49  ;;  %2172 = vmatpush1.bf16.msra.mxu1 %v3266_v50  ;;  %v3343_v49 = vld [vmem:[%s3676_s5 + $0x50] sm:$0xff]  }
 0x189   :  { %2009 = vmatprep.subr.bf16.mxu0 %v3271_v53  ;;  %2173 = vmatprep.subr.bf16.mxu1 %v3274_v54  ;;  %v3344_v50 = vld [vmem:[%s3676_s5 + $0xd0] sm:$0xff]  }
 0x18a   :  { %v3345_v53 = vld [vmem:[%s3676_s5 + $0x10] sm:$0xff]  }
 0x18b   :  { %v3346_v54 = vld [vmem:[%s3676_s5 + $0x90] sm:$0xff]  }
 0x18c   :  { %2010 = vmatpush1.bf16.msra.mxu0 %v3269_v55  ;;  %2174 = vmatpush1.bf16.msra.mxu1 %v3272_v56  ;;  %v3347_v55 = vld [vmem:[%s3676_s5 + $0x58] sm:$0xff]  }
 0x18d   :  { %2011 = vmatprep.subr.bf16.mxu0 %v3277_v57  ;;  %2175 = vmatprep.subr.bf16.mxu1 %v3280_v58  ;;  %v3348_v56 = vld [vmem:[%s3676_s5 + $0xd8] sm:$0xff]  }
 0x18e   :  { %v3349_v57 = vld [vmem:[%s3676_s5 + $0x18] sm:$0xff]  }
 0x18f   :  { %v3350_v58 = vld [vmem:[%s3676_s5 + $0x98] sm:$0xff]  }
 0x190   :  { %2012 = vmatpush1.bf16.msra.mxu0 %v3275_v59  ;;  %2176 = vmatpush1.bf16.msra.mxu1 %v3278_v60  ;;  %v3351_v59 = vld [vmem:[%s3676_s5 + $0x60] sm:$0xff]  }
 0x191   :  { %2013 = vmatprep.subr.bf16.mxu0 %v3283_v61  ;;  %2177 = vmatprep.subr.bf16.mxu1 %v3286_v62  ;;  %v3352_v60 = vld [vmem:[%s3676_s5 + $0xe0] sm:$0xff]  }
 0x192   :  { %v3353_v61 = vld [vmem:[%s3676_s5 + $0x20] sm:$0xff]  }
 0x193   :  { %v3354_v62 = vld [vmem:[%s3676_s5 + $0xa0] sm:$0xff]  }
 0x194   :  { %2014 = vmatpush1.bf16.msra.mxu0 %v3281_v63  ;;  %2178 = vmatpush1.bf16.msra.mxu1 %v3284_v0  ;;  %v3355_v63 = vld [vmem:[%s3676_s5 + $0x68] sm:$0xff]  }
 0x195   :  { %2015 = vmatprep.subr.bf16.mxu0 %v3289_v1  ;;  %2179 = vmatprep.subr.bf16.mxu1 %v3292_v2  ;;  %v3356_v0 = vld [vmem:[%s3676_s5 + $0xe8] sm:$0xff]  }
 0x196   :  { %v3357_v1 = vld [vmem:[%s3676_s5 + $0x28] sm:$0xff]  }
 0x197   :  { %v3358_v2 = vld [vmem:[%s3676_s5 + $0xa8] sm:$0xff]  }
 0x198   :  { %2016 = vmatpush1.bf16.msra.mxu0 %v3287_v3  ;;  %2180 = vmatpush1.bf16.msra.mxu1 %v3290_v4  ;;  %v3359_v3 = vld [vmem:[%s3676_s5 + $0x70] sm:$0xff]  }
 0x199   :  { %2017 = vmatprep.subr.bf16.mxu0 %v3295_v5  ;;  %2181 = vmatprep.subr.bf16.mxu1 %v3298_v33  ;;  %v3360_v4 = vld [vmem:[%s3676_s5 + $0xf0] sm:$0xff]  }
 0x19a   :  { %v3361_v5 = vld [vmem:[%s3676_s5 + $0x30] sm:$0xff]  }
 0x19b   :  { %v3362_v33 = vld [vmem:[%s3676_s5 + $0xb0] sm:$0xff]  }
 0x19c   :  { %2018 = vmatpush1.bf16.msra.mxu0 %v3293_v6  ;;  %2182 = vmatpush1.bf16.msra.mxu1 %v3296_v7  ;;  %v3363_v6 = vld [vmem:[%s3676_s5 + $0x78] sm:$0xff]  }
 0x19d   :  { %2019 = vmatprep.subr.bf16.mxu0 %v3301_v8  ;;  %2183 = vmatprep.subr.bf16.mxu1 %v3304_v10  ;;  %v3364_v7 = vld [vmem:[%s3676_s5 + $0xf8] sm:$0xff]  }
 0x19e   :  { %v3365_v8 = vld [vmem:[%s3676_s5 + $0x38] sm:$0xff]  }
 0x19f   :  { %v3366_v10 = vld [vmem:[%s3676_s5 + $0xb8] sm:$0xff]  }
 0x1a0   :  { %2020 = vmatpush1.bf16.msra.mxu0 %v3299_v11  ;;  %2184 = vmatpush1.bf16.msra.mxu1 %v3302_v52  ;;  %v574_v11 = vld [vmem:[%s3675_s4] sm:$0xf] }
 0x1a1   :  { %2021 = vmatprep.subr.bf16.mxu0 %v3307_v13  ;;  %2185 = vmatprep.subr.bf16.mxu1 %v3310_v14  ;;  %v579_v52 = vrot.slane %v574_v11, %v56_v23  ;;  %v587_v13 = vrot.slane %v574_v11, %v64_v45  ;;  %v583_v14 = vrot.slane %v574_v11, %v60_v25 }
 0x1a4   :  { %2022 = vmatpush1.bf16.msra.mxu0 %v3305_v15  ;;  %2186 = vmatpush1.bf16.msra.mxu1 %v3308_v16  ;;  %v591_v15 = vrot.slane %v574_v11, %v68_v26 }
 0x1a5   :  { %2023 = vmatprep.subr.bf16.mxu0 %v3313_v17  ;;  %2187 = vmatprep.subr.bf16.mxu1 %v3316_v18 }
 0x1a8   :  { %2024 = vmatpush1.bf16.msra.mxu0 %v3311_v19  ;;  %2188 = vmatpush1.bf16.msra.mxu1 %v3314_v20 }
 0x1a9   :  { %2025 = vmatprep.subr.bf16.mxu0 %v3319_v27  ;;  %2189 = vmatprep.subr.bf16.mxu1 %v3322_v28 }
 0x1ac   :  { %2026 = vmatpush1.bf16.msra.mxu0 %v3317_v29  ;;  %2190 = vmatpush1.bf16.msra.mxu1 %v3320_v51 }
 0x1ad   :  { %2027 = vmatprep.subr.bf16.mxu0 %v3325_v31  ;;  %2191 = vmatprep.subr.bf16.mxu1 %v3328_v32 }
 0x1b0   :  { %2028 = vmatpush1.bf16.msra.mxu0 %v3323_v34  ;;  %2192 = vmatpush1.bf16.msra.mxu1 %v3326_v35 }
 0x1b1   :  { %2029 = vmatprep.subr.bf16.mxu0 %v3331_v36  ;;  %2193 = vmatprep.subr.bf16.mxu1 %v3334_v37  ;;  %v2841_v37 = vld [vmem:[%s3677_s6] ss:$0 sm:$0xff] }
 0x1b4   :  { %2030 = vmatpush1.bf16.msra.mxu0 %v3329_v38  ;;  %2194 = vmatpush1.bf16.msra.mxu1 %v3332_v39 }
 0x1b5   :  { %2874 = vmatprep.subr.bf16.mxu0 %v3335_v24  ;;  %2896 = vmatprep.subr.bf16.mxu1 %v3336_v41 }
 0x1b7   :  { %2032 = vmatmul.mubr.bf16.vlgmr.msra.gmra.mrb[8].mxu0 %v316_v43  ;;  %2196 = vmatmul.mubr.bf16.vlgmr.msra.gmra.mrb[8].mxu1 %v316_v43 }
 0x1b8   :  { %2875 = vmatpush3.bf16.msra.mxu0 %v3337_v9  ;;  %2897 = vmatpush3.bf16.msra.mxu1 %v3338_v42 }
 0x1b9   :  { %2876 = vmatprep.subr.bf16.mxu0 %v3339_v44  ;;  %2898 = vmatprep.subr.bf16.mxu1 %v3340_v46 }
 0x1bc   :  { %2877 = vmatpush3.bf16.msra.mxu0 %v3341_v47  ;;  %2899 = vmatpush3.bf16.msra.mxu1 %v3342_v48 }
 0x1bd   :  { %2878 = vmatprep.subr.bf16.mxu0 %v3343_v49  ;;  %2900 = vmatprep.subr.bf16.mxu1 %v3344_v50 }
 0x1c0   :  { %2879 = vmatpush3.bf16.msra.mxu0 %v3345_v53  ;;  %2901 = vmatpush3.bf16.msra.mxu1 %v3346_v54 }
 0x1c1   :  { %2880 = vmatprep.subr.bf16.mxu0 %v3347_v55  ;;  %2902 = vmatprep.subr.bf16.mxu1 %v3348_v56 }
 0x1c4   :  { %2881 = vmatpush3.bf16.msra.mxu0 %v3349_v57  ;;  %2903 = vmatpush3.bf16.msra.mxu1 %v3350_v58 }
 0x1c5   :  { %2882 = vmatprep.subr.bf16.mxu0 %v3351_v59  ;;  %2904 = vmatprep.subr.bf16.mxu1 %v3352_v60 }
 0x1c8   :  { %2883 = vmatpush3.bf16.msra.mxu0 %v3353_v61  ;;  %2905 = vmatpush3.bf16.msra.mxu1 %v3354_v62 }
 0x1c9   :  { %2884 = vmatprep.subr.bf16.mxu0 %v3355_v63  ;;  %2906 = vmatprep.subr.bf16.mxu1 %v3356_v0 }
 0x1cc   :  { %2885 = vmatpush3.bf16.msra.mxu0 %v3357_v1  ;;  %2907 = vmatpush3.bf16.msra.mxu1 %v3358_v2 }
 0x1cd   :  { %2886 = vmatprep.subr.bf16.mxu0 %v3359_v3  ;;  %2908 = vmatprep.subr.bf16.mxu1 %v3360_v4 }
 0x1d0   :  { %2887 = vmatpush3.bf16.msra.mxu0 %v3361_v5  ;;  %2909 = vmatpush3.bf16.msra.mxu1 %v3362_v33 }
 0x1d1   :  { %2888 = vmatprep.subr.bf16.mxu0 %v3363_v6  ;;  %2910 = vmatprep.subr.bf16.mxu1 %v3364_v7 }
 0x1d4   :  { %2889 = vmatpush3.bf16.msra.mxu0 %v3365_v8  ;;  %2911 = vmatpush3.bf16.msra.mxu1 %v3366_v10 }
 0x28a   :  { %v2033_v16 = vpop.f32.mrb[8].mxu0  ;;  %v2197_v17 = vpop.f32.mrb[8].mxu1 }
 0x28b   :  { %v2918_v18 = vadd.f32 %v2033_v16, %v579_v52  ;;  %v2920_v19 = vadd.f32 %v2197_v17, %v587_v13  ;;  %v2035_v20 = vpop.f32.mrb[9].mxu0  ;;  %v2199_v21 = vpop.f32.mrb[9].mxu1 }
 0x28c   :  { %v2919_v27 = vadd.f32 %v2035_v20, %v583_v14  ;;  %v2921_v28 = vadd.f32 %v2199_v21, %v591_v15  ;;  %v2037_v29 = vpop.f32.mrb[10].mxu0  ;;  %v2201_v51 = vpop.f32.mrb[10].mxu1 }
 0x28d   :  { %v2204_v23 = vmax.f32 %v2918_v18, 0.0  ;;  %v2206_v30 = vmax.f32 %v2920_v19, 0.0  ;;  %v2038_v31 = vpop.f32.mrb[11].mxu0  ;;  %v2202_v45 = vpop.f32.mrb[11].mxu1 }
 0x28e   :  { %v2205_v32 = vmax.f32 %v2919_v27, 0.0  ;;  %v2207_v34 = vmax.f32 %v2921_v28, 0.0 }
 0x28f   :  { %v2208_v22 = vpack.c.bf16 %v2204_v23, %v2204_v23  ;;  %v2210_v26 = vpack.c.bf16 %v2206_v30, %v2206_v30 }
 0x290   :  { %v2209_v25 = vpack.c.bf16 %v2205_v32, %v2205_v32  ;;  %v2211_v35 = vpack.c.bf16 %v2207_v34, %v2207_v34 }
 0x292   :  { %2507 = vmatprep.mubr.bf16.mxu0 %v2209_v25  ;;  %2547 = vmatprep.mubr.bf16.mxu1 %v2211_v35 }
 0x293   :  { %2508 = vmatmul.mubr.bf16.vlgmr.msra.gmra.mrb[12].mxu0 %v2208_v22  ;;  %2548 = vmatmul.mubr.bf16.vlgmr.msra.gmra.mrb[12].mxu1 %v2210_v26 }
 0x366   :  { %v2890_v12 = vpop.f32.mrb[12].mxu0  ;;  %v2912_v36 = vpop.f32.mrb[12].mxu1 }
 0x367   :  { %v2891_v38 = vpop.f32.mrb[13].mxu0  ;;  %v2913_v39 = vpop.f32.mrb[13].mxu1 }
 0x368   :  { %v2892_v40 = vadd.f32 %v2891_v38, %v2890_v12  ;;  %v2914_v24 = vadd.f32 %v2913_v39, %v2912_v36  ;;  %v2893_v41 = vpop.f32.mrb[14].mxu0  ;;  %v2915_v9 = vpop.f32.mrb[14].mxu1 }
 0x369   :  { %v2894_v42 = vpop.f32.mrb[15].mxu0  ;;  %v2916_v43 = vpop.f32.mrb[15].mxu1 }
 0x36a   :  { %v2510_v44 = vadd.f32 %v2892_v40, %v2841_v37 }
 0x36c   :  { %v2550_v46 = vadd.f32 %v2914_v24, %v2510_v44 }
 0x36e   :  { %v2555_v47 = vmax.f32 %v2550_v46, 0.0 }
 0x370   :  { %2557 = vst.msk [vmem:[#allocation5] sm:$0xff] %vm2556_vm1, %v2555_v47 }
 0x371   :  { %3400 = shalt.err (!%p3397_p12)
}
 0x372   :  { %s3401_s23 = scalar_lea.hbm %s3678_s7, 128 }
 0x373   :  { %p3402_p13 = scmp.ne.s32.totalorder %s3678_s7, %s3401_s23  ;;  %p3405_p0 = scmp.lt.u32.totalorder %s3401_s23, %s3678_s7 }
 0x375   :  { %p3407_p1 = pnand %p3405_p0, %p3402_p13 }
 0x377   :  { %3410 = shalt.err (!%p3407_p1)
}
 0x378   :  { %2567 = dma.vmem_to_hbm [thread:$0]  %s2565_s3, 128, %s3678_s7, [#allocation4]  }
 0x379   :  { %3413 = dma.done.wait [#allocation4], 128  }
 0x37a   :  { %3414 = vsyncadd [#allocation4], 4294967168 }
 0x37b   :  { %2571 = vsyncpa [#allocation3], 1 }
 0x37c   :  { %2572 = vsyncpa [#allocation4], 1 }

</bundles_post_ra>
